<compile_context>
chip_gen: v7x
topology: tpu7x:2x2x1
jax: 0.10.0
libtpu: 0.0.40
codegen_flags: <defaults>
</compile_context>

<pallas_src>
import functools
import math

import jax
import jax.numpy as jnp
from jax.experimental import pallas as pl
from jax.experimental.pallas import tpu as pltpu


def _round_up(x, m):
    return (x + m - 1) // m * m


# ------------------------------------------------------------------ linear --
def _accumulate(x_ref, w_ref, acc_ref):
    """One K-step of the tiled matmul into the f32 VMEM accumulator."""
    @pl.when(pl.program_id(2) == 0)
    def _zero():
        acc_ref[...] = jnp.zeros(acc_ref.shape, dtype=acc_ref.dtype)

    acc_ref[...] += jnp.dot(x_ref[...], w_ref[...],
                            preferred_element_type=jnp.float32)


def _bias_act(acc, b_ref, activation):
    acc = acc + b_ref[...].astype(jnp.float32)
    if activation == "gelu":
        acc = jax.nn.gelu(acc, approximate=True)
    return acc


def _linear_kernel(x_ref, w_ref, b_ref, o_ref, acc_ref, *, activation):
    _accumulate(x_ref, w_ref, acc_ref)

    @pl.when(pl.program_id(2) == pl.num_programs(2) - 1)
    def _epilogue():
        o_ref[...] = _bias_act(acc_ref[...], b_ref, activation).astype(o_ref.dtype)


def _linear_ln_kernel(x_ref, w_ref, b_ref, r_ref, g_ref, bt_ref, o_ref,
                      acc_ref, *, activation, eps):
    """Matmul + bias (+act) with residual-add + LayerNorm fused in the epilogue.

    Requires the full feature dim E in a single tile so the row reduction is
    local to the tile.
    """
    _accumulate(x_ref, w_ref, acc_ref)

    @pl.when(pl.program_id(2) == pl.num_programs(2) - 1)
    def _epilogue():
        v = _bias_act(acc_ref[...], b_ref, activation)
        v = v + r_ref[...].astype(jnp.float32)
        mu = jnp.mean(v, axis=-1, keepdims=True)
        c = v - mu
        var = jnp.mean(c * c, axis=-1, keepdims=True)
        y = c * jax.lax.rsqrt(var + eps) * g_ref[...] + bt_ref[...]
        o_ref[...] = y.astype(o_ref.dtype)


def _linear_split3_kernel(x_ref, w_ref, b_ref, q_ref, k_ref, v_ref, acc_ref,
                          *, d):
    """QKV projection that emits q, k, v as three outputs (no HBM re-slicing)."""
    _accumulate(x_ref, w_ref, acc_ref)

    @pl.when(pl.program_id(2) == pl.num_programs(2) - 1)
    def _epilogue():
        acc = acc_ref[...] + b_ref[...].astype(jnp.float32)
        q_ref[...] = acc[:, 0:d].astype(q_ref.dtype)
        k_ref[...] = acc[:, d:2 * d].astype(k_ref.dtype)
        v_ref[...] = acc[:, 2 * d:3 * d].astype(v_ref.dtype)


def linear(x2d, w, b, *, activation=None, residual=None, ln=None, ln_eps=1e-5,
           split3=False, out_dtype=None, compute_dtype=None,
           tm_cap=256, te_cap=256, tk_cap=512):
    """y = x2d @ w + b (f32 accumulation), with optional fused epilogues.

    x2d: (M, K), w: (K, E), b: (E,).
      * activation="gelu"      : fused GELU.
      * residual + ln          : fused LayerNorm(residual + y)   (needs E whole).
      * split3                 : returns (q, k, v) = y split on the last dim.
      * compute_dtype=bfloat16 : bf16 matmul inputs, f32 accumulation.
    """
    M, K = x2d.shape
    E = w.shape[1]
    out_dtype = out_dtype if out_dtype is not None else x2d.dtype
    fused_ln = ln is not None
    assert not (fused_ln and split3)

    if compute_dtype is not None:
        x2d = x2d.astype(compute_dtype)
        w = w.astype(compute_dtype)

    if fused_ln or split3:
        # E is kept whole (row-local LN / contiguous q|k|v split).  Bound the
        # double-buffered (TK, E) weight-tile footprint so large-D configs stay
        # inside the v5e 16 MiB scoped-VMEM default and v7x's 64 MiB physical.
        itemsize = jnp.dtype(w.dtype).itemsize
        tk_fit = max(128, (2 * 1024 * 1024 // max(1, itemsize * E)) // 128 * 128)
        tk_cap = min(tk_cap, tk_fit)

    # --- K tiling (zero padding is exact for the reduction) ---
    if K <= tk_cap:
        TK, Kp = K, K
    else:
        TK = tk_cap
        Kp = _round_up(K, TK)
    # --- M tiling ---
    if M <= tm_cap:
        TM, Mp = M, M
    else:
        TM = tm_cap
        Mp = _round_up(M, TM)
    # --- E tiling (single tile when the epilogue needs the whole row) ---
    if fused_ln or split3 or E <= te_cap:
        TE, Ep = E, E
    else:
        TE = te_cap
        Ep = _round_up(E, TE)

    if Kp != K:
        x2d = jnp.pad(x2d, ((0, 0), (0, Kp - K)))
        w = jnp.pad(w, ((0, Kp - K), (0, 0)))
    if Mp != M:
        x2d = jnp.pad(x2d, ((0, Mp - M), (0, 0)))
    if Ep != E:
        w = jnp.pad(w, ((0, 0), (0, Ep - E)))
        b = jnp.pad(b, (0, Ep - E))

    b2d = b.reshape(1, Ep).astype(jnp.float32)
    grid = (Mp // TM, Ep // TE, Kp // TK)   # M outer (megacore), K innermost.

    in_specs = [
        pl.BlockSpec((TM, TK), lambda i, j, k: (i, k)),
        pl.BlockSpec((TK, TE), lambda i, j, k: (k, j)),
        pl.BlockSpec((1, TE), lambda i, j, k: (0, j)),
    ]
    operands = [x2d, w, b2d]

    if fused_ln:
        r = residual
        if Mp != M:
            r = jnp.pad(r, ((0, Mp - M), (0, 0)))
        g2 = ln["gamma"].reshape(1, E).astype(jnp.float32)
        bt2 = ln["beta"].reshape(1, E).astype(jnp.float32)
        in_specs += [
            pl.BlockSpec((TM, E), lambda i, j, k: (i, 0)),
            pl.BlockSpec((1, E), lambda i, j, k: (0, 0)),
            pl.BlockSpec((1, E), lambda i, j, k: (0, 0)),
        ]
        operands += [r, g2, bt2]
        kernel = functools.partial(_linear_ln_kernel, activation=activation,
                                   eps=ln_eps)
        out_shape = jax.ShapeDtypeStruct((Mp, E), out_dtype)
        out_specs = pl.BlockSpec((TM, E), lambda i, j, k: (i, 0))
    elif split3:
        assert activation is None and E % 3 == 0
        d = E // 3
        kernel = functools.partial(_linear_split3_kernel, d=d)
        out_shape = tuple(jax.ShapeDtypeStruct((Mp, d), out_dtype)
                          for _ in range(3))
        out_specs = tuple(pl.BlockSpec((TM, d), lambda i, j, k: (i, 0))
                          for _ in range(3))
    else:
        kernel = functools.partial(_linear_kernel, activation=activation)
        out_shape = jax.ShapeDtypeStruct((Mp, Ep), out_dtype)
        out_specs = pl.BlockSpec((TM, TE), lambda i, j, k: (i, j))

    out = pl.pallas_call(
        kernel,
        out_shape=out_shape,
        grid=grid,
        in_specs=in_specs,
        out_specs=out_specs,
        scratch_shapes=[pltpu.VMEM((TM, TE), jnp.float32)],
        compiler_params=pltpu.CompilerParams(
            dimension_semantics=("parallel", "parallel", "arbitrary")),
    )(*operands)

    if split3:
        q, k, v = out
        if Mp != M:
            q, k, v = q[:M], k[:M], v[:M]
        return q, k, v
    if Mp != M or Ep != E:
        out = out[:M, :E]
    return out


# --------------------------------------------------------------- attention --
def _flash_attn_kernel(q_ref, k_ref, v_ref, o_ref, m_sc, l_sc, acc_sc, *,
                       n_heads, scale):
    """Online-softmax multi-head attention for one batch element.

    Input/output blocks are lane-dense (seq, D); heads are split in-register
    with static slices.  The KV sequence axis is the innermost ("arbitrary")
    grid axis; m/l/acc live in VMEM scratch across KV steps (flash pattern).
    """
    j = pl.program_id(1)
    _, d = q_ref.shape
    dh = d // n_heads

    @pl.when(j == 0)
    def _init():
        m_sc[...] = jnp.full(m_sc.shape, -jnp.inf, dtype=m_sc.dtype)
        l_sc[...] = jnp.zeros(l_sc.shape, dtype=l_sc.dtype)
        acc_sc[...] = jnp.zeros(acc_sc.shape, dtype=acc_sc.dtype)

    # Fold 1/sqrt(dh) into q: seq*D mults instead of seq*seq on the scores.
    q = q_ref[...] * jnp.asarray(scale, dtype=q_ref.dtype)
    k = k_ref[...]
    v = v_ref[...]

    for h in range(n_heads):
        lo, hi = h * dh, (h + 1) * dh
        qh, kh, vh = q[:, lo:hi], k[:, lo:hi], v[:, lo:hi]
        # Matmuls run in the input dtype (bf16 on the fast path), f32 accumulate.
        s = jax.lax.dot_general(qh, kh, (((1,), (1,)), ((), ())),
                                preferred_element_type=jnp.float32)
        m_prev = m_sc[h]
        m_new = jnp.maximum(m_prev, jnp.max(s, axis=-1, keepdims=True))
        alpha = jnp.exp(m_prev - m_new)
        p = jnp.exp(s - m_new)
        l_sc[h] = alpha * l_sc[h] + jnp.sum(p, axis=-1, keepdims=True)
        acc_sc[h] = alpha * acc_sc[h] + jnp.dot(
            p.astype(vh.dtype), vh, preferred_element_type=jnp.float32)
        m_sc[h] = m_new

    @pl.when(j == pl.num_programs(1) - 1)
    def _finalize():
        # EUP approx reciprocal on the bf16 fast path; exact for f32 verification.
        approx = jnp.dtype(o_ref.dtype) != jnp.dtype(jnp.float32)
        for h in range(n_heads):
            inv = pl.reciprocal(l_sc[h], approx=approx)
            o_ref[:, h * dh:(h + 1) * dh] = (acc_sc[h] * inv).astype(o_ref.dtype)


def attention(q, k, v, batch, seq, n_heads, *, kv_tile_cap=512):
    """q, k, v: (batch*seq, D) -> (batch*seq, D) multi-head softmax attention."""
    m, d = q.shape
    dh = d // n_heads
    q3 = q.reshape(batch, seq, d)           # free reshapes, no HBM copies
    k3 = k.reshape(batch, seq, d)
    v3 = v.reshape(batch, seq, d)

    if seq <= kv_tile_cap or seq % kv_tile_cap != 0:
        tkv = seq                            # small / ragged: single KV tile
    else:
        tkv = kv_tile_cap

    out = pl.pallas_call(
        functools.partial(_flash_attn_kernel, n_heads=n_heads,
                          scale=1.0 / math.sqrt(dh)),
        out_shape=jax.ShapeDtypeStruct((batch, seq, d), q.dtype),
        grid=(batch, seq // tkv),
        in_specs=[
            pl.BlockSpec((None, seq, d), lambda b, j: (b, 0, 0)),
            pl.BlockSpec((None, tkv, d), lambda b, j: (b, j, 0)),
            pl.BlockSpec((None, tkv, d), lambda b, j: (b, j, 0)),
        ],
        out_specs=pl.BlockSpec((None, seq, d), lambda b, j: (b, 0, 0)),
        scratch_shapes=[
            pltpu.VMEM((n_heads, seq, 1), jnp.float32),
            pltpu.VMEM((n_heads, seq, 1), jnp.float32),
            pltpu.VMEM((n_heads, seq, dh), jnp.float32),
        ],
        compiler_params=pltpu.CompilerParams(
            dimension_semantics=("parallel", "arbitrary")),
    )(q3, k3, v3)
    return out.reshape(m, d)


# --------------------------------------------------------------- LRF block --
def lrf_block(x, params, *, compute_dtype=jnp.bfloat16):
    """x: (B, N, D).  compute_dtype=None runs everything in the input dtype."""
    B, N, D = x.shape
    M = B * N
    x2d = x.reshape(M, D)

    def attn_core(p):
        # QKV projection emits q/k/v directly (no XLA reshape/transpose/slice).
        q, k, v = linear(x2d, p["w_qkv"], p["b_qkv"], split3=True,
                         out_dtype=compute_dtype, compute_dtype=compute_dtype)
        return attention(q, k, v, B, N, p["n_heads"])

    # x1 = LN1(x + proj(attn1(x)))  -- add+LN fused into the out-proj epilogue.
    o1 = attn_core(params["attn1"])
    x1 = linear(o1, params["attn1"]["w_proj"], params["attn1"]["b_proj"],
                residual=x2d, ln=params["norm1"],
                out_dtype=x.dtype, compute_dtype=compute_dtype)

    # x2 = LN2(x + proj(attn2(x)))
    o2 = attn_core(params["attn2"])
    x2 = linear(o2, params["attn2"]["w_proj"], params["attn2"]["b_proj"],
                residual=x2d, ln=params["norm2"],
                out_dtype=x.dtype, compute_dtype=compute_dtype)

    # out = LN3(x1 + fc2(gelu(fc1(x2))))  -- add+LN fused into fc2's epilogue.
    h = linear(x2, params["mlp"]["w1"], params["mlp"]["b1"], activation="gelu",
               out_dtype=compute_dtype, compute_dtype=compute_dtype)
    out = linear(h, params["mlp"]["w2"], params["mlp"]["b2"],
                 residual=x1, ln=params["norm3"],
                 out_dtype=x.dtype, compute_dtype=compute_dtype)
    return out.reshape(B, N, D)


# -------------------------------------------------------- pure-JAX reference
def _reference(x, params):
    def ln(v, p, eps=1e-5):
        mu = v.mean(-1, keepdims=True)
        var = ((v - mu) ** 2).mean(-1, keepdims=True)
        return (v - mu) * jax.lax.rsqrt(var + eps) * p["gamma"] + p["beta"]

    def attn(v, p):
        B, N, D = v.shape
        H = p["n_heads"]
        dh = D // H
        qkv = v.reshape(B * N, D) @ p["w_qkv"] + p["b_qkv"]
        qkv = qkv.reshape(B, N, 3, H, dh)
        q = qkv[:, :, 0].transpose(0, 2, 1, 3)
        k = qkv[:, :, 1].transpose(0, 2, 1, 3)
        vv = qkv[:, :, 2].transpose(0, 2, 1, 3)
        s = jnp.einsum("bhqd,bhkd->bhqk", q, k) / math.sqrt(dh)
        a = jax.nn.softmax(s, axis=-1)
        o = jnp.einsum("bhqk,bhkd->bhqd", a, vv)
        o = o.transpose(0, 2, 1, 3).reshape(B * N, D)
        return (o @ p["w_proj"] + p["b_proj"]).reshape(B, N, D)

    def mlp_ref(v, p):
        B, N, D = v.shape
        h = jax.nn.gelu(v.reshape(B * N, D) @ p["w1"] + p["b1"],
                        approximate=True)
        return (h @ p["w2"] + p["b2"]).reshape(B, N, D)

    x1 = ln(x + attn(x, params["attn1"]), params["norm1"])
    x2 = ln(x + attn(x, params["attn2"]), params["norm2"])
    return ln(x1 + mlp_ref(x2, params["mlp"]), params["norm3"])


# ---------------------------------------------------------------- params ----
def init_params(key, dim, n_heads, mlp_ratio):
    hidden = int(dim * mlp_ratio)
    ks = jax.random.split(key, 18)

    def lin(kw, kb, fan_in, fan_out):
        s = 1.0 / math.sqrt(fan_in)
        w = jax.random.uniform(kw, (fan_in, fan_out), jnp.float32, -s, s)
        b = jax.random.uniform(kb, (fan_out,), jnp.float32, -s, s)
        return w, b

    def norm(kg, kb, d):
        return {"gamma": 1.0 + 0.02 * jax.random.normal(kg, (d,), jnp.float32),
                "beta": 0.02 * jax.random.normal(kb, (d,), jnp.float32)}

    def attn(k0, k1, k2, k3):
        wq, bq = lin(k0, k1, dim, 3 * dim)
        wp, bp = lin(k2, k3, dim, dim)
        return {"n_heads": n_heads, "w_qkv": wq, "b_qkv": bq,
                "w_proj": wp, "b_proj": bp}

    w1, b1 = lin(ks[8], ks[9], dim, hidden)
    w2, b2 = lin(ks[10], ks[11], hidden, dim)
    return {
        "attn1": attn(ks[0], ks[1], ks[2], ks[3]),
        "attn2": attn(ks[4], ks[5], ks[6], ks[7]),
        "mlp": {"w1": w1, "b1": b1, "w2": w2, "b2": b2},
        "norm1": norm(ks[12], ks[13], dim),
        "norm2": norm(ks[14], ks[15], dim),
        "norm3": norm(ks[16], ks[17], dim),
    }


if __name__ == "__main__":
    # Small shapes consistent with the module: batch=2, seq=8, dim=32, heads=4.
    B, N, DIM, HEADS, MLP_RATIO = 2, 8, 32, 4, 4.0

    key = jax.random.PRNGKey(0)
    kx, kp = jax.random.split(key)
    x = jax.random.normal(kx, (B, N, DIM), dtype=jnp.float32)
    params = init_params(kp, DIM, HEADS, MLP_RATIO)

    ref = _reference(x, params)

    # Pure-f32 path: tight verification against the XLA reference.
    out_f32 = jax.block_until_ready(lrf_block(x, params, compute_dtype=None))
    assert out_f32.shape == (B, N, DIM), out_f32.shape
    diff_f32 = float(jnp.max(jnp.abs(out_f32 - ref)))
    assert jnp.allclose(out_f32, ref, atol=1e-2, rtol=1e-2), diff_f32

    # Default bf16-inputs / f32-accumulate fast path: looser tolerance.
    out_bf16 = jax.block_until_ready(lrf_block(x, params))
    diff_bf16 = float(jnp.max(jnp.abs(out_bf16.astype(jnp.float32) - ref)))
    assert jnp.allclose(out_bf16.astype(jnp.float32), ref,
                        atol=1e-1, rtol=1e-1), diff_bf16

    print("KERNEL_OK")
</pallas_src>

<mosaic_0001>
module attributes {stable_mosaic.version = 11 : i64} {
  func.func @_linear_split3_kernel(%arg0: i32, %arg1: i32, %arg2: i32, %arg3: memref<16x32xf32, #tpu.memory_space<vmem>>, %arg4: memref<32x96xf32, #tpu.memory_space<vmem>>, %arg5: memref<1x96xf32, #tpu.memory_space<vmem>>, %arg6: memref<16x32xf32, #tpu.memory_space<vmem>>, %arg7: memref<16x32xf32, #tpu.memory_space<vmem>>, %arg8: memref<16x32xf32, #tpu.memory_space<vmem>>, %arg9: memref<16x96xf32, #tpu.memory_space<vmem>>) attributes {dimension_semantics = [#tpu.dimension_semantics<parallel>, #tpu.dimension_semantics<parallel>, #tpu.dimension_semantics<arbitrary>], iteration_bounds = array<i64: 1, 1, 1>, scalar_prefetch = 0 : i64, scratch_operands = 1 : i64, tpu.core_type = #tpu.core_type<tc>, window_params = [{transform_indices = @transform_0, window_bounds = array<i64: 16, 32>}, {transform_indices = @transform_1, window_bounds = array<i64: 32, 96>}, {transform_indices = @transform_2, window_bounds = array<i64: 1, 96>}, {transform_indices = @transform_3, window_bounds = array<i64: 16, 32>}, {transform_indices = @transform_4, window_bounds = array<i64: 16, 32>}, {transform_indices = @transform_5, window_bounds = array<i64: 16, 32>}]} {
    %c0_i32 = arith.constant 0 : i32
    %0 = arith.cmpi eq, %arg2, %c0_i32 : i32
    %1 = arith.extui %0 : i1 to i32
    %c0_i32_0 = arith.constant 0 : i32
    %2 = arith.cmpi ne, %1, %c0_i32_0 : i32
    scf.if %2 {
      %cst_10 = arith.constant 0.000000e+00 : f32
      %12 = vector.broadcast %cst_10 : f32 to vector<16x96xf32>
      %c0_11 = arith.constant 0 : index
      %c0_12 = arith.constant 0 : index
      %13 = vector.load %arg9[%c0_11, %c0_12] : memref<16x96xf32, #tpu.memory_space<vmem>>, vector<16x96xf32>
      tpu.vector_store %arg9[%c0_11, %c0_12], %12 {strides = array<i32>} : memref<16x96xf32, #tpu.memory_space<vmem>>, vector<16x96xf32>,
    } else {
    }
    %c0 = arith.constant 0 : index
    %c0_1 = arith.constant 0 : index
    %3 = vector.load %arg9[%c0, %c0_1] : memref<16x96xf32, #tpu.memory_space<vmem>>, vector<16x96xf32>
    %c0_2 = arith.constant 0 : index
    %c0_3 = arith.constant 0 : index
    %4 = vector.load %arg3[%c0_2, %c0_3] : memref<16x32xf32, #tpu.memory_space<vmem>>, vector<16x32xf32>
    %c0_4 = arith.constant 0 : index
    %c0_5 = arith.constant 0 : index
    %5 = vector.load %arg4[%c0_4, %c0_5] : memref<32x96xf32, #tpu.memory_space<vmem>>, vector<32x96xf32>
    %cst = arith.constant dense<0.000000e+00> : vector<16x96xf32>
    %6 = tpu.matmul %4, %5, %cst {dimension_numbers = #tpu.dot_dimension_numbers<[1], [0], [0], [1], [0, 0, 1, 1], [], []>} : vector<16x32xf32>, vector<32x96xf32>, vector<16x96xf32> -> vector<16x96xf32>
    %7 = arith.addf %3, %6 : vector<16x96xf32>
    %c0_6 = arith.constant 0 : index
    %c0_7 = arith.constant 0 : index
    %8 = vector.load %arg9[%c0_6, %c0_7] : memref<16x96xf32, #tpu.memory_space<vmem>>, vector<16x96xf32>
    tpu.vector_store %arg9[%c0_6, %c0_7], %7 {strides = array<i32>} : memref<16x96xf32, #tpu.memory_space<vmem>>, vector<16x96xf32>,
    %c0_i32_8 = arith.constant 0 : i32
    %9 = arith.cmpi eq, %arg2, %c0_i32_8 : i32
    %10 = arith.extui %9 : i1 to i32
    %c0_i32_9 = arith.constant 0 : i32
    %11 = arith.cmpi ne, %10, %c0_i32_9 : i32
    scf.if %11 {
      %c0_10 = arith.constant 0 : index
      %c0_11 = arith.constant 0 : index
      %12 = vector.load %arg9[%c0_10, %c0_11] : memref<16x96xf32, #tpu.memory_space<vmem>>, vector<16x96xf32>
      %c0_12 = arith.constant 0 : index
      %c0_13 = arith.constant 0 : index
      %13 = vector.load %arg5[%c0_12, %c0_13] : memref<1x96xf32, #tpu.memory_space<vmem>>, vector<1x96xf32>
      %14 = vector.broadcast %13 : vector<1x96xf32> to vector<16x96xf32>
      %15 = arith.addf %12, %14 : vector<16x96xf32>
      %16 = vector.extract_strided_slice %15 {offsets = [0, 0], sizes = [16, 32], strides = [1, 1]} : vector<16x96xf32> to vector<16x32xf32>
      %c0_14 = arith.constant 0 : index
      %c0_15 = arith.constant 0 : index
      %17 = vector.load %arg6[%c0_14, %c0_15] : memref<16x32xf32, #tpu.memory_space<vmem>>, vector<16x32xf32>
      tpu.vector_store %arg6[%c0_14, %c0_15], %16 {strides = array<i32>} : memref<16x32xf32, #tpu.memory_space<vmem>>, vector<16x32xf32>,
      %18 = vector.extract_strided_slice %15 {offsets = [0, 32], sizes = [16, 32], strides = [1, 1]} : vector<16x96xf32> to vector<16x32xf32>
      %c0_16 = arith.constant 0 : index
      %c0_17 = arith.constant 0 : index
      %19 = vector.load %arg7[%c0_16, %c0_17] : memref<16x32xf32, #tpu.memory_space<vmem>>, vector<16x32xf32>
      tpu.vector_store %arg7[%c0_16, %c0_17], %18 {strides = array<i32>} : memref<16x32xf32, #tpu.memory_space<vmem>>, vector<16x32xf32>,
      %20 = vector.extract_strided_slice %15 {offsets = [0, 64], sizes = [16, 32], strides = [1, 1]} : vector<16x96xf32> to vector<16x32xf32>
      %c0_18 = arith.constant 0 : index
      %c0_19 = arith.constant 0 : index
      %21 = vector.load %arg8[%c0_18, %c0_19] : memref<16x32xf32, #tpu.memory_space<vmem>>, vector<16x32xf32>
      tpu.vector_store %arg8[%c0_18, %c0_19], %20 {strides = array<i32>} : memref<16x32xf32, #tpu.memory_space<vmem>>, vector<16x32xf32>,
    } else {
    }
    return
  }
  func.func @transform_0(%arg0: i32, %arg1: i32, %arg2: i32) -> (i32, i32) {
    %c0_i32 = arith.constant 0 : i32
    return %arg0, %arg2 : i32, i32
  }
  func.func @transform_1(%arg0: i32, %arg1: i32, %arg2: i32) -> (i32, i32) {
    %c0_i32 = arith.constant 0 : i32
    return %arg2, %arg1 : i32, i32
  }
  func.func @transform_2(%arg0: i32, %arg1: i32, %arg2: i32) -> (i32, i32) {
    %c0_i32 = arith.constant 0 : i32
    %c0_i32_0 = arith.constant 0 : i32
    return %c0_i32, %arg1 : i32, i32
  }
  func.func @transform_3(%arg0: i32, %arg1: i32, %arg2: i32) -> (i32, i32) {
    %c0_i32 = arith.constant 0 : i32
    %c0_i32_0 = arith.constant 0 : i32
    return %arg0, %c0_i32 : i32, i32
  }
  func.func @transform_4(%arg0: i32, %arg1: i32, %arg2: i32) -> (i32, i32) {
    %c0_i32 = arith.constant 0 : i32
    %c0_i32_0 = arith.constant 0 : i32
    return %arg0, %c0_i32 : i32, i32
  }
  func.func @transform_5(%arg0: i32, %arg1: i32, %arg2: i32) -> (i32, i32) {
    %c0_i32 = arith.constant 0 : i32
    %c0_i32_0 = arith.constant 0 : i32
    return %arg0, %c0_i32 : i32, i32
  }
}

</mosaic_0001>

<bundles_post_ra>
// kernel: tpu_custom_call.1
= control target key start
LH: loop header
LB: loop body
LE: loop exit
PB: predicated region body
PF: predicated region fallthrough
CT: control target
= control target key end

     0   :  { %11 = vsyncpa [#allocation4], 0  ;;  %s525_s0 = inlined_call_operand.hbm [shape: f32[16,32], index: 0, kind: input, shape index: {}]   ;;  %s526_s1 = inlined_call_operand.hbm [shape: f32[32,96], index: 1, kind: input, shape index: {}]   ;;  %s527_s2 = inlined_call_operand.vmem [shape: f32[1,96], index: 2, kind: input, shape index: {}]   ;;  %s528_s3 = inlined_call_operand.hbm [shape: f32[16,32], index: 3, kind: output, shape index: {0}]   ;;  %s529_s4 = inlined_call_operand.hbm [shape: f32[16,32], index: 4, kind: output, shape index: {1}]   ;;  %s530_s5 = inlined_call_operand.hbm [shape: f32[16,32], index: 5, kind: output, shape index: {2}]  }
   0x1   :  { %12 = vsyncpa [#allocation7], 0 }
   0x2   :  { %13 = vsyncpa [#allocation5], 0 }
   0x3   :  { %14 = vsyncpa [#allocation10], 0  ;;  %s388_s18 = smov [#allocation3]   ;;  %s270_s22 = scalar_lea.hbm %s525_s0, 256 }
   0x4   :  { %s20_s19 = sshll.u32 %s388_s18, 4  ;;  %p271_p0 = scmp.ne.s32.totalorder %s525_s0, %s270_s22  ;;  %s21_s19 = int_to_ptr.vmem [resolvable:$true] %s20_s19 }
   0x5   :  { %p274_p1 = scmp.lt.u32.totalorder %s270_s22, %s525_s0 }
   0x7   :  { %p276_p2 = pnand %p274_p1, %p271_p0 }
   0x9   :  { %279 = shalt.err (!%p276_p2)
}
   0xa   :  { %s280_s27 = scalar_lea.vmem %s21_s19, 256  ;;  %p285_p4 = scmp.lt.s32.totalorder %s21_s19, %s21_s19 }
   0xb   :  { %p281_p3 = scmp.ne.s32.totalorder %s21_s19, %s280_s27  ;;  %p286_p5 = scmp.lt.s32.totalorder %s280_s27, %s280_s27 }
   0xd   :  { %p287_p6 = por %p286_p5, %p285_p4 }
   0xf   :  { %p288_p7 = pnand %p287_p6, %p281_p3 }
  0x11   :  { %291 = shalt.err (!%p288_p7)
}
  0x12   :  { %s389_s28 = smov 128   ;;  %s390_s29 = smov 8  }
  0x13   :  { %26 = dma.hbm_to_vmem [thread:$0]  %s525_s0, 256, %s21_s19, [#allocation4], %s389_s28, %s389_s28, %s390_s29  }
  0x14   :  { %s391_s7 = smov [#allocation6]   ;;  %s292_s11 = scalar_lea.hbm %s526_s1, 512 }
  0x15   :  { %s32_s8 = sshll.u32 %s391_s7, 4  ;;  %p293_p8 = scmp.ne.s32.totalorder %s526_s1, %s292_s11  ;;  %s33_s8 = int_to_ptr.vmem [resolvable:$true] %s32_s8 }
  0x16   :  { %p296_p9 = scmp.lt.u32.totalorder %s292_s11, %s526_s1 }
  0x18   :  { %p298_p10 = pnand %p296_p9, %p293_p8 }
  0x1a   :  { %301 = shalt.err (!%p298_p10)
}
  0x1b   :  { %s302_s16 = scalar_lea.vmem %s33_s8, 512  ;;  %p307_p12 = scmp.lt.s32.totalorder %s33_s8, %s33_s8 }
  0x1c   :  { %p303_p11 = scmp.ne.s32.totalorder %s33_s8, %s302_s16  ;;  %p308_p13 = scmp.lt.s32.totalorder %s302_s16, %s302_s16 }
  0x1e   :  { %p309_p0 = por %p308_p13, %p307_p12 }
  0x20   :  { %p310_p1 = pnand %p309_p0, %p303_p11 }
  0x22   :  { %313 = shalt.err (!%p310_p1)
}
  0x23   :  { %38 = dma.hbm_to_vmem [thread:$0]  %s526_s1, 512, %s33_s8, [#allocation7], %s389_s28, %s389_s28, %s390_s29  }
  0x24   :  { %380 = dma.done.wait [#allocation4], 256  }
  0x25   :  { %381 = vsyncadd [#allocation4], 4294967040 }
  0x26   :  { %382 = dma.done.wait [#allocation7], 512  }
  0x27   :  { %383 = vsyncadd [#allocation7], 4294966784  ;;  %vm51_vm0 = vcmask 785408   ;;  %v392_v0 = vmov 0.0   ;;  %vm62_vm1 = vcmask 261120   ;;  %v58_v1 = vld [vmem:[#allocation6] sm:$0xff] }
  0x28   :  { %53 = vst.msk [vmem:[#allocation2 + $0x8] sm:$0xff] %vm51_vm0, %v392_v0  ;;  %52 = vst.msk [vmem:[#allocation2] sm:$0xff] %vm51_vm0, %v392_v0  ;;  %v59_v2 = vld [vmem:[#allocation6 + $0x8] sm:$0xff]  ;;  %v60_v3 = vld [vmem:[#allocation6 + $0x10] sm:$0xff]  ;;  %s393_s19 = smov [#allocation8]   ;;  %s394_s21 = smov 64  }
  0x29   :  { %v252_v4 = vpack.c.bf16 %v59_v2, %v58_v1  ;;  %v61_v5 = vld [vmem:[#allocation6 + $0x18] sm:$0xff]  ;;  %v56_v6 = vld [vmem:[#allocation3] sm:$0xff]  ;;  %v234_v15 = vld [vmem:[%s527_s2] ss:$0 sm:$0xff]  ;;  %s188_s20 = sshll.u32 %s393_s19, 4  ;;  %s395_s22 = smov 96   ;;  %s189_s20 = int_to_ptr.vmem [resolvable:$true] %s188_s20 }
  0x2a   :  { %v256_v7 = vpack.c.bf16 %v61_v5, %v60_v3  ;;  %249 = vmatprep.mubr.msk.f32.mxu0 %vm62_vm1, %v56_v6  ;;  %v57_v8 = vld [vmem:[#allocation3 + $0x8] sm:$0xff]  ;;  %s314_s23 = scalar_lea.vmem %s189_s20, 256  ;;  %p319_p3 = scmp.lt.s32.totalorder %s189_s20, %s189_s20 }
  0x2b   :  { %253 = vmatprep.subr.bf16.mxu0 %v252_v4  ;;  %p315_p2 = scmp.ne.s32.totalorder %s189_s20, %s314_s23  ;;  %p320_p4 = scmp.lt.s32.totalorder %s314_s23, %s314_s23 }
  0x2c   :  { %255 = vmatpush3.bf16.msra.mxu0 %v252_v4 }
  0x2d   :  { %257 = vmatprep.subr.bf16.mxu0 %v256_v7  ;;  %p321_p5 = por %p320_p4, %p319_p3 }
  0x2f   :  { %v55_v9 = vld [vmem:[#allocation2 + $0x8] sm:$0xff]  ;;  %v54_v10 = vld [vmem:[#allocation2] sm:$0xff]  ;;  %p322_p6 = pnand %p321_p5, %p315_p2 }
  0x30   :  { %259 = vmatpush3.bf16.msra.mxu0 %v256_v7 }
  0x33   :  { %250 = vmatmul.mubr.msk.f32.vlgmr.msra.gmra.mrb[0].mxu0 %vm62_vm1, %v57_v8 }
 0x106   :  { %v251_v11 = vpop.f32.mrb[0].mxu0 }
 0x107   :  { %v145_v12 = vadd.f32 %v251_v11, %v55_v9  ;;  %v135_v13 = vpop.f32.mrb[1].mxu0 }
 0x108   :  { %v144_v14 = vadd.f32 %v135_v13, %v54_v10 }
 0x109   :  { %148 = vst.msk [vmem:[#allocation2 + $0x8] sm:$0xff] %vm51_vm0, %v145_v12 }
 0x10a   :  { %147 = vst.msk [vmem:[#allocation2] sm:$0xff] %vm51_vm0, %v144_v14 }
 0x110   :  { %v153_v16 = vld [vmem:[#allocation2 + $0x8] sm:$0xff] }
 0x111   :  { %v152_v17 = vld [vmem:[#allocation2] sm:$0xff]  ;;  %v162_v18 = vadd.f32 %v234_v15, %v153_v16 }
 0x112   :  { %v161_v19 = vadd.f32 %v234_v15, %v152_v17 }
 0x113   :  { %164 = vst.msk [vmem:[#allocation8 + $0x8] sm:$0xff] %vm62_vm1, %v162_v18 }
 0x114   :  { %175 = vrot.lane.b32.xlu1 %v161_v19, %s394_s21  ;;  %163 = vst.msk [vmem:[#allocation8] sm:$0xff] %vm62_vm1, %v161_v19  ;;  %167 = vrot.lane.b32.xlu0 %v161_v19, %s395_s22 }
 0x115   :  { %325 = shalt.err (!%p322_p6)
}
 0x116   :  { %s326_s25 = scalar_lea.hbm %s528_s3, 256 }
 0x117   :  { %p327_p7 = scmp.ne.s32.totalorder %s528_s3, %s326_s25  ;;  %p330_p8 = scmp.lt.u32.totalorder %s326_s25, %s528_s3 }
 0x119   :  { %p332_p9 = pnand %p330_p8, %p327_p7 }
 0x11b   :  { %335 = shalt.err (!%p332_p9)
}
 0x11c   :  { %194 = dma.vmem_to_hbm [thread:$0]  %s189_s20, 256, %s528_s3, [#allocation5], %s389_s28, %s389_s28, %s390_s29  }
 0x11d   :  { %177 = vrot.lane.b32.xlu1 %v162_v18, %s394_s21  ;;  %169 = vrot.lane.b32.xlu0 %v162_v18, %s395_s22  ;;  %s396_s9 = smov [#allocation9]   ;;  %s397_s11 = smov [#allocation11]  }
 0x11e   :  { %s200_s10 = sshll.u32 %s396_s9, 4  ;;  %s212_s12 = sshll.u32 %s397_s11, 4  ;;  %s201_s10 = int_to_ptr.vmem [resolvable:$true] %s200_s10  ;;  %s486_s12 = int_to_ptr.vmem [resolvable:$true] %s212_s12 }
 0x11f   :  { %s336_s3 = scalar_lea.vmem %s201_s10, 256  ;;  %p341_p11 = scmp.lt.s32.totalorder %s201_s10, %s201_s10 }
 0x120   :  { %p337_p10 = scmp.ne.s32.totalorder %s201_s10, %s336_s3  ;;  %p342_p12 = scmp.lt.s32.totalorder %s336_s3, %s336_s3 }
 0x122   :  { %p343_p13 = por %p342_p12, %p341_p11 }
 0x124   :  { %p344_p0 = pnand %p343_p13, %p337_p10 }
 0x186   :  { %v176_v20 = vpop.permute.xlu1 %175  ;;  %v168_v21 = vpop.permute.xlu0 %167 }
 0x187   :  { %181 = vst.msk [vmem:[#allocation11] sm:$0xff] %vm62_vm1, %v176_v20  ;;  %173 = vst.msk [vmem:[#allocation9] sm:$0xff] %vm62_vm1, %v168_v21 }
 0x18f   :  { %v178_v22 = vpop.permute.xlu1 %177  ;;  %v170_v23 = vpop.permute.xlu0 %169 }
 0x190   :  { %182 = vst.msk [vmem:[#allocation11 + $0x8] sm:$0xff] %vm62_vm1, %v178_v22  ;;  %174 = vst.msk [vmem:[#allocation9 + $0x8] sm:$0xff] %vm62_vm1, %v170_v23 }
 0x191   :  { %347 = shalt.err (!%p344_p0)
}
 0x192   :  { %s348_s15 = scalar_lea.hbm %s529_s4, 256 }
 0x193   :  { %p349_p1 = scmp.ne.s32.totalorder %s529_s4, %s348_s15  ;;  %p352_p2 = scmp.lt.u32.totalorder %s348_s15, %s529_s4 }
 0x195   :  { %p354_p3 = pnand %p352_p2, %p349_p1 }
 0x197   :  { %357 = shalt.err (!%p354_p3)
}
 0x198   :  { %206 = dma.vmem_to_hbm [thread:$0]  %s201_s10, 256, %s529_s4, [#allocation10], %s389_s28, %s389_s28, %s390_s29  }
 0x199   :  { %s358_s20 = scalar_lea.vmem %s486_s12, 256  ;;  %p363_p5 = scmp.lt.s32.totalorder %s486_s12, %s486_s12 }
 0x19a   :  { %p359_p4 = scmp.ne.s32.totalorder %s486_s12, %s358_s20  ;;  %p364_p6 = scmp.lt.s32.totalorder %s358_s20, %s358_s20 }
 0x19c   :  { %p365_p7 = por %p364_p6, %p363_p5 }
 0x19e   :  { %p366_p8 = pnand %p365_p7, %p359_p4 }
 0x1a0   :  { %369 = shalt.err (!%p366_p8)
}
 0x1a1   :  { %s370_s23 = scalar_lea.hbm %s530_s5, 256 }
 0x1a2   :  { %p371_p9 = scmp.ne.s32.totalorder %s530_s5, %s370_s23  ;;  %p374_p10 = scmp.lt.u32.totalorder %s370_s23, %s530_s5 }
 0x1a4   :  { %p376_p11 = pnand %p374_p10, %p371_p9 }
 0x1a6   :  { %379 = shalt.err (!%p376_p11)
}
 0x1a7   :  { %218 = dma.vmem_to_hbm [thread:$0]  %s486_s12, 256, %s530_s5, [#allocation10], %s389_s28, %s389_s28, %s390_s29  }
 0x1a8   :  { %384 = dma.done.wait [#allocation5], 256  }
 0x1a9   :  { %385 = vsyncadd [#allocation5], 4294967040 }
 0x1aa   :  { %386 = dma.done.wait [#allocation10], 512  }
 0x1ab   :  { %387 = vsyncadd [#allocation10], 4294966784 }
 0x1ac   :  { %228 = vsyncpa [#allocation4], 1 }
 0x1ad   :  { %229 = vsyncpa [#allocation7], 1 }
 0x1ae   :  { %230 = vsyncpa [#allocation5], 1 }
 0x1af   :  { %231 = vsyncpa [#allocation10], 1 }

</bundles_post_ra>
